<compile_context>
chip_gen: v5e
topology: v5e:2x2
jax: 0.10.0
libtpu: 0.0.40
codegen_flags: <defaults>
</compile_context>

<pallas_src>
import functools
import math

import jax
import jax.numpy as jnp
from jax.experimental import pallas as pl
from jax.experimental.pallas import tpu as pltpu


def _round_up(x, m):
    return (x + m - 1) // m * m


# ----------------------------- link functions ------------------------------
def _make_link(link: str):
    # Matches the PyTorch link_dict exactly:
    #   'exp'      -> nn.Identity()
    #   'relu'     -> log(clamp(x, min=1e-5))          (no actual ReLU, per spec)
    #   'softplus' -> log(clamp(softplus(x), min=1e-5))
    if link == "exp":
        return lambda x: x
    if link == "relu":
        return lambda x: jnp.log(jnp.maximum(x, 1e-5))
    if link == "softplus":
        return lambda x: jnp.log(jnp.maximum(jax.nn.softplus(x), 1e-5))
    raise ValueError(f"unknown link: {link}")


# ------------------------------- the kernel --------------------------------
def _linear_kernel(link_fn, xg_ref, wg_ref, xa_ref, wa_ref, bias_ref,
                   o_ref, acc_ref):
    # xg_ref : (TB, TK)   activation tile (streamed over K)
    # wg_ref : (1, TK)    lane-major geno weights (scale pre-folded)
    # xa_ref : (TB, Ka)   anno activations for this B-tile (fetched once per i)
    # wa_ref : (1, Ka)    lane-major anno weights (scale pre-folded)
    # bias_ref: (1, 1)    combined geno+anno bias, SMEM scalar
    # o_ref  : (1, 1, TB) lane-dense output block
    # acc_ref: (1, TB)    f32 accumulator scratch
    k = pl.program_id(1)

    @pl.when(k == 0)
    def _init():
        acc_ref[...] = jnp.zeros_like(acc_ref)

    # (1, TK) x (TB, TK) contracted on TK -> (1, TB): lane-dense partial result.
    acc_ref[...] += jax.lax.dot_general(
        wg_ref[...], xg_ref[...],
        dimension_numbers=(((1,), (1,)), ((), ())),
        preferred_element_type=jnp.float32)

    @pl.when(k == pl.num_programs(1) - 1)
    def _finalize():
        # Anno contribution + bias + link only once per B-tile.
        anno = jax.lax.dot_general(
            wa_ref[...], xa_ref[...],
            dimension_numbers=(((1,), (1,)), ((), ())),
            preferred_element_type=jnp.float32)
        res = link_fn(acc_ref[...] + anno + bias_ref[0, 0])
        o_ref[0] = res.astype(o_ref.dtype)


# ------------------------------- the wrapper --------------------------------
def linear_forward(geno_tracks, anno_tracks, params, *,
                   average_geno=False, link="exp", compute_dtype=None,
                   tb_max=256, tk_max=2048):
    """Pallas equivalent of Linear.forward. Returns shape (B,) float32.

    compute_dtype: optional streaming dtype for the activations/weights
    (e.g. jnp.bfloat16 halves HBM traffic); accumulation is always f32.
    """
    wg, bg, wa, ba = params
    B = geno_tracks.shape[0]

    # Flatten / average in plain JAX (cheap glue relative to the K-stream).
    if average_geno:
        xg = geno_tracks.mean(-1)                           # (B, Cg)
    else:
        xg = geno_tracks.reshape(B, -1)                     # (B, Cg*W)
    xa = anno_tracks                                        # (B, Ka)

    geno_scale = 1.0 / math.sqrt(math.prod(xg.shape[1:]))   # 1/sqrt(xg[0].numel())
    anno_scale = 1.0 / math.sqrt(math.prod(xa.shape[1:]))   # 1/sqrt(xa[0].numel())

    Kg, Ka = xg.shape[1], xa.shape[1]
    act_dtype = compute_dtype if compute_dtype is not None else xg.dtype

    # Fold the input scaling into the tiny lane-major weight rows, and both
    # biases into one scalar -> removes per-tile VPU work from the kernel.
    wg_row = (wg.reshape(1, Kg).astype(jnp.float32) * geno_scale).astype(act_dtype)
    wa_row = (wa.reshape(1, Ka).astype(jnp.float32) * anno_scale).astype(act_dtype)
    bias = (bg.reshape(()) + ba.reshape(())).astype(jnp.float32).reshape(1, 1)

    xg = xg.astype(act_dtype)
    xa = xa.astype(act_dtype)

    # Tile sizes: lane/sublane aligned; capped so double-buffered xg stays well
    # under the scoped VMEM budget on all generations (v5e 16MiB .. v7x 32MiB).
    TB = min(tb_max, _round_up(B, 8))
    TK = min(tk_max, _round_up(Kg, 128))
    Bp = _round_up(B, TB)
    Kp = _round_up(Kg, TK)
    NB, NK = Bp // TB, Kp // TK

    # Zero-pad remainder tiles (zero-padded K contributes 0; padded B rows are
    # computed then sliced away).
    if (Bp, Kp) != (B, Kg):
        xg = jnp.pad(xg, ((0, Bp - B), (0, Kp - Kg)))
    if Bp != B:
        xa = jnp.pad(xa, ((0, Bp - B), (0, 0)))
    if Kp != Kg:
        wg_row = jnp.pad(wg_row, ((0, 0), (0, Kp - Kg)))

    kernel = functools.partial(_linear_kernel, _make_link(link))

    grid_spec = pltpu.PrefetchScalarGridSpec(
        num_scalar_prefetch=0,
        grid=(NB, NK),
        in_specs=[
            pl.BlockSpec((TB, TK), lambda i, k: (i, k)),           # xg stream
            pl.BlockSpec((1, TK), lambda i, k: (0, k)),            # wg row
            pl.BlockSpec((TB, Ka), lambda i, k: (i, 0)),           # xa (once per i)
            pl.BlockSpec((1, Ka), lambda i, k: (0, 0)),            # wa row
            pl.BlockSpec(memory_space=pltpu.MemorySpace.SMEM),     # bias scalar
        ],
        out_specs=pl.BlockSpec((1, 1, TB), lambda i, k: (i, 0, 0)),
        scratch_shapes=[pltpu.VMEM((1, TB), jnp.float32)],
    )

    out = pl.pallas_call(
        kernel,
        out_shape=jax.ShapeDtypeStruct((NB, 1, TB), jnp.float32),
        grid_spec=grid_spec,
        compiler_params=pltpu.CompilerParams(
            dimension_semantics=("parallel", "arbitrary"),
            vmem_limit_bytes=32 * 1024 * 1024,
        ),
    )(xg, wg_row, xa, wa_row, bias)

    return out.reshape(Bp)[:B]                                     # (B,)


# --------------------------- deterministic params ---------------------------
def init_params(key, input_geno_dim, input_anno_dim, window_size,
                average_geno=False):
    """Mimics nn.Linear default init: U(-1/sqrt(fan_in), 1/sqrt(fan_in))."""
    kg_w, kg_b, ka_w, ka_b = jax.random.split(key, 4)
    kg_fan = input_geno_dim * (window_size if not average_geno else 1)
    ka_fan = input_anno_dim
    bound_g = 1.0 / math.sqrt(kg_fan)
    bound_a = 1.0 / math.sqrt(ka_fan)
    wg = jax.random.uniform(kg_w, (kg_fan, 1), jnp.float32, -bound_g, bound_g)
    bg = jax.random.uniform(kg_b, (1, 1), jnp.float32, -bound_g, bound_g)
    wa = jax.random.uniform(ka_w, (ka_fan, 1), jnp.float32, -bound_a, bound_a)
    ba = jax.random.uniform(ka_b, (1, 1), jnp.float32, -bound_a, bound_a)
    return wg, bg, wa, ba


# ----------------------------------- main ------------------------------------
if __name__ == "__main__":
    B, input_geno_dim, window_size, input_anno_dim = 4, 8, 8, 16

    key = jax.random.PRNGKey(0)
    k_geno, k_anno, k_param, k_param2 = jax.random.split(key, 4)

    geno_tracks = jax.random.normal(k_geno, (B, input_geno_dim, window_size),
                                    jnp.float32)
    anno_tracks = jax.random.normal(k_anno, (B, input_anno_dim), jnp.float32)

    # ---- test 1: flatten path, 'exp' (identity) link, f32 streaming --------
    params = init_params(k_param, input_geno_dim, input_anno_dim, window_size)
    out = jax.block_until_ready(
        linear_forward(geno_tracks, anno_tracks, params, link="exp"))

    wg, bg, wa, ba = params
    xg_ref = geno_tracks.reshape(B, -1) / math.sqrt(input_geno_dim * window_size)
    xa_ref = anno_tracks / math.sqrt(input_anno_dim)
    ref = (xg_ref @ wg + bg + xa_ref @ wa + ba).squeeze(-1)
    assert out.shape == (B,)
    assert jnp.allclose(out, ref, atol=1e-4, rtol=1e-4), (out, ref)

    # ---- test 2: same path, bf16-streamed activations (looser tolerance) ---
    out_bf16 = jax.block_until_ready(
        linear_forward(geno_tracks, anno_tracks, params, link="exp",
                       compute_dtype=jnp.bfloat16))
    assert jnp.allclose(out_bf16, ref, atol=3e-2, rtol=3e-2), (out_bf16, ref)

    # ---- test 3: average_geno path with 'relu' link -------------------------
    wg2, bg2, wa2, ba2 = init_params(k_param2, input_geno_dim, input_anno_dim,
                                     window_size, average_geno=True)
    # Shift bias so the pre-link value is safely positive (stable log check).
    ba2 = ba2 + 2.0
    params2 = (wg2, bg2, wa2, ba2)
    out2 = jax.block_until_ready(
        linear_forward(geno_tracks, anno_tracks, params2,
                       average_geno=True, link="relu"))
    xg2 = geno_tracks.mean(-1) / math.sqrt(input_geno_dim)
    pre2 = xg2 @ wg2 + bg2 + xa_ref @ wa2 + ba2
    ref2 = jnp.log(jnp.maximum(pre2, 1e-5)).squeeze(-1)
    assert jnp.allclose(out2, ref2, atol=1e-4, rtol=1e-4), (out2, ref2)

    print("KERNEL_OK")
</pallas_src>

<mosaic_0001>
module attributes {stable_mosaic.version = 11 : i64} {
  func.func @_linear_kernel(%arg0: i32, %arg1: i32, %arg2: memref<8x128xf32, #tpu.memory_space<vmem>>, %arg3: memref<1x128xf32, #tpu.memory_space<vmem>>, %arg4: memref<8x16xf32, #tpu.memory_space<vmem>>, %arg5: memref<1x16xf32, #tpu.memory_space<vmem>>, %arg6: memref<1x1xf32, #tpu.memory_space<smem>>, %arg7: memref<1x1x8xf32, #tpu.memory_space<vmem>>, %arg8: memref<1x8xf32, #tpu.memory_space<vmem>>) attributes {dimension_semantics = [#tpu.dimension_semantics<parallel>, #tpu.dimension_semantics<arbitrary>], iteration_bounds = array<i64: 1, 1>, scalar_prefetch = 0 : i64, scratch_operands = 1 : i64, tpu.core_type = #tpu.core_type<tc>, window_params = [{transform_indices = @transform_0, window_bounds = array<i64: 8, 128>}, {transform_indices = @transform_1, window_bounds = array<i64: 1, 128>}, {transform_indices = @transform_2, window_bounds = array<i64: 8, 16>}, {pipeline_mode = #tpu.pipeline_mode<synchronous>, transform_indices = @transform_3, window_bounds = array<i64: 1, 16>}, {transform_indices = @transform_4, window_bounds = array<i64: 1, 1>}, {transform_indices = @transform_5, window_bounds = array<i64: 1, 1, 8>}]} {
    %c0_i32 = arith.constant 0 : i32
    %0 = arith.cmpi eq, %arg1, %c0_i32 : i32
    %1 = arith.extui %0 : i1 to i32
    %c0_i32_0 = arith.constant 0 : i32
    %2 = arith.cmpi ne, %1, %c0_i32_0 : i32
    scf.if %2 {
      %cst_10 = arith.constant 0.000000e+00 : f32
      %12 = vector.broadcast %cst_10 : f32 to vector<1x8xf32>
      %c0_11 = arith.constant 0 : index
      %c0_12 = arith.constant 0 : index
      %13 = vector.load %arg8[%c0_11, %c0_12] : memref<1x8xf32, #tpu.memory_space<vmem>>, vector<1x8xf32>
      tpu.vector_store %arg8[%c0_11, %c0_12], %12 {strides = array<i32>} : memref<1x8xf32, #tpu.memory_space<vmem>>, vector<1x8xf32>,
    } else {
    }
    %c0 = arith.constant 0 : index
    %c0_1 = arith.constant 0 : index
    %3 = vector.load %arg8[%c0, %c0_1] : memref<1x8xf32, #tpu.memory_space<vmem>>, vector<1x8xf32>
    %c0_2 = arith.constant 0 : index
    %c0_3 = arith.constant 0 : index
    %4 = vector.load %arg3[%c0_2, %c0_3] : memref<1x128xf32, #tpu.memory_space<vmem>>, vector<1x128xf32>
    %c0_4 = arith.constant 0 : index
    %c0_5 = arith.constant 0 : index
    %5 = vector.load %arg2[%c0_4, %c0_5] : memref<8x128xf32, #tpu.memory_space<vmem>>, vector<8x128xf32>
    %cst = arith.constant dense<0.000000e+00> : vector<1x8xf32>
    %6 = tpu.matmul %4, %5, %cst {dimension_numbers = #tpu.dot_dimension_numbers<[1], [1], [0], [0], [0, 0, 1, 0], [], []>} : vector<1x128xf32>, vector<8x128xf32>, vector<1x8xf32> -> vector<1x8xf32>
    %7 = arith.addf %3, %6 : vector<1x8xf32>
    %c0_6 = arith.constant 0 : index
    %c0_7 = arith.constant 0 : index
    %8 = vector.load %arg8[%c0_6, %c0_7] : memref<1x8xf32, #tpu.memory_space<vmem>>, vector<1x8xf32>
    tpu.vector_store %arg8[%c0_6, %c0_7], %7 {strides = array<i32>} : memref<1x8xf32, #tpu.memory_space<vmem>>, vector<1x8xf32>,
    %c0_i32_8 = arith.constant 0 : i32
    %9 = arith.cmpi eq, %arg1, %c0_i32_8 : i32
    %10 = arith.extui %9 : i1 to i32
    %c0_i32_9 = arith.constant 0 : i32
    %11 = arith.cmpi ne, %10, %c0_i32_9 : i32
    scf.if %11 {
      %c0_10 = arith.constant 0 : index
      %c0_11 = arith.constant 0 : index
      %12 = vector.load %arg5[%c0_10, %c0_11] : memref<1x16xf32, #tpu.memory_space<vmem>>, vector<1x16xf32>
      %c0_12 = arith.constant 0 : index
      %c0_13 = arith.constant 0 : index
      %13 = vector.load %arg4[%c0_12, %c0_13] : memref<8x16xf32, #tpu.memory_space<vmem>>, vector<8x16xf32>
      %cst_14 = arith.constant dense<0.000000e+00> : vector<1x8xf32>
      %14 = tpu.matmul %12, %13, %cst_14 {dimension_numbers = #tpu.dot_dimension_numbers<[1], [1], [0], [0], [0, 0, 1, 0], [], []>} : vector<1x16xf32>, vector<8x16xf32>, vector<1x8xf32> -> vector<1x8xf32>
      %c0_15 = arith.constant 0 : index
      %c0_16 = arith.constant 0 : index
      %15 = vector.load %arg8[%c0_15, %c0_16] : memref<1x8xf32, #tpu.memory_space<vmem>>, vector<1x8xf32>
      %16 = arith.addf %15, %14 : vector<1x8xf32>
      %c0_17 = arith.constant 0 : index
      %c0_18 = arith.constant 0 : index
      %17 = memref.load %arg6[%c0_17, %c0_18] : memref<1x1xf32, #tpu.memory_space<smem>>
      %18 = vector.broadcast %17 : f32 to vector<1x8xf32>
      %19 = arith.addf %16, %18 : vector<1x8xf32>
      %c0_19 = arith.constant 0 : index
      %c0_20 = arith.constant 0 : index
      %c0_21 = arith.constant 0 : index
      %20 = vector.load %arg7[%c0_19, %c0_20, %c0_21] : memref<1x1x8xf32, #tpu.memory_space<vmem>>, vector<1x1x8xf32>
      %21 = vector.shape_cast %20 : vector<1x1x8xf32> to vector<1x8xf32>
      %22 = vector.shape_cast %19 : vector<1x8xf32> to vector<1x1x8xf32>
      tpu.vector_store %arg7[%c0_19, %c0_20, %c0_21], %22 {strides = array<i32>} : memref<1x1x8xf32, #tpu.memory_space<vmem>>, vector<1x1x8xf32>,
    } else {
    }
    return
  }
  func.func @transform_0(%arg0: i32, %arg1: i32) -> (i32, i32) {
    %c0_i32 = arith.constant 0 : i32
    return %arg0, %arg1 : i32, i32
  }
  func.func @transform_1(%arg0: i32, %arg1: i32) -> (i32, i32) {
    %c0_i32 = arith.constant 0 : i32
    %c0_i32_0 = arith.constant 0 : i32
    return %c0_i32, %arg1 : i32, i32
  }
  func.func @transform_2(%arg0: i32, %arg1: i32) -> (i32, i32) {
    %c0_i32 = arith.constant 0 : i32
    %c0_i32_0 = arith.constant 0 : i32
    return %arg0, %c0_i32 : i32, i32
  }
  func.func @transform_3(%arg0: i32, %arg1: i32) -> (i32, i32) {
    %c0_i32 = arith.constant 0 : i32
    %c0_i32_0 = arith.constant 0 : i32
    %c0_i32_1 = arith.constant 0 : i32
    return %c0_i32, %c0_i32_0 : i32, i32
  }
  func.func @transform_4(%arg0: i32, %arg1: i32) -> (i32, i32) {
    %c0_i32 = arith.constant 0 : i32
    %c0_i32_0 = arith.constant 0 : i32
    %c0_i32_1 = arith.constant 0 : i32
    return %c0_i32, %c0_i32_0 : i32, i32
  }
  func.func @transform_5(%arg0: i32, %arg1: i32) -> (i32, i32, i32) {
    %c0_i32 = arith.constant 0 : i32
    %c0_i32_0 = arith.constant 0 : i32
    %c0_i32_1 = arith.constant 0 : i32
    return %arg0, %c0_i32, %c0_i32_0 : i32, i32, i32
  }
}

</mosaic_0001>

<bundles_post_ra>
// kernel: tpu_custom_call.1
= control target key start
LH: loop header
LB: loop body
LE: loop exit
PB: predicated region body
PF: predicated region fallthrough
CT: control target
= control target key end

     0   :  { %11 = vsyncpa [#allocation5], 0  ;;  %s277_s0 = inlined_call_operand.hbm [shape: f32[8,128], index: 0, kind: input, shape index: {}]   ;;  %s278_s1 = inlined_call_operand.vmem [shape: f32[1,128], index: 1, kind: input, shape index: {}]   ;;  %s279_s2 = inlined_call_operand.hbm [shape: f32[8,16], index: 2, kind: input, shape index: {}]   ;;  %s280_s3 = inlined_call_operand.vmem [shape: f32[1,16], index: 3, kind: input, shape index: {}]   ;;  %s281_s4 = inlined_call_operand.<no memory space> [shape: f32[1,1], index: 4, kind: input, shape index: {}]   ;;  %s282_s5 = inlined_call_operand.hbm [shape: f32[1,1,8], index: 5, kind: output, shape index: {}]  }
   0x1   :  { %12 = vsyncpa [#allocation8], 0 }
   0x2   :  { %13 = vsyncpa [#allocation6], 0  ;;  %s19_s20 = sshll.u32 %s277_s0, 4  ;;  %s222_s21 = smov [#allocation4]   ;;  %s20_s20 = int_to_ptr.hbm [resolvable:$true] %s19_s20 }
   0x3   :  { %s21_s22 = sshll.u32 %s222_s21, 4  ;;  %s32_s25 = sshll.u32 %s279_s2, 4  ;;  %s22_s22 = int_to_ptr.vmem [resolvable:$true] %s21_s22  ;;  %s33_s25 = int_to_ptr.hbm [resolvable:$true] %s32_s25 }
   0x4   :  { %24 = dma.hbm_to_vmem [thread:$0]  %s20_s20, 128, %s22_s22, [#allocation5]  }
   0x5   :  { %s223_s26 = smov [#allocation7]  }
   0x6   :  { %s34_s27 = sshll.u32 %s223_s26, 4  ;;  %s35_s27 = int_to_ptr.vmem [resolvable:$true] %s34_s27 }
   0x7   :  { %37 = dma.hbm_to_vmem [thread:$0]  %s33_s25, 128, %s35_s27, [#allocation8]  }
   0x8   :  { %216 = dma.done.wait [#allocation5], 128  }
   0x9   :  { %217 = vsyncadd [#allocation5], 4294967168 }
   0xa   :  { %218 = dma.done.wait [#allocation8], 128  }
   0xb   :  { %219 = vsyncadd [#allocation8], 4294967168  ;;  %vm54_vm0 = vcmask 57344   ;;  %v224_v0 = vmov 0.0   ;;  %vm87_vm1 = vcmask 130048   ;;  %v58_v1 = vld [vmem:[#allocation4] sm:$0xff]  ;;  %v117_v10 = vstv %s281_s4 }
   0xc   :  { %55 = vst.msk [vmem:[#allocation2] sm:$0x1] %vm54_vm0, %v224_v0  ;;  %v86_v2 = vld [vmem:[#allocation7] sm:$0xff]  ;;  %74 = vmatpush.xpose.msra.mxu0 %v58_v1  ;;  %v57_v3 = vld [vmem:[%s278_s1] sm:$0x1]  ;;  %s225_s7 = smov [#allocation9]  }
   0xd   :  { %138 = vmatpush.xpose.msk.msra.mxu1 %vm87_vm1, %v86_v2  ;;  %v85_v4 = vld [vmem:[%s280_s3] sm:$0x1]  ;;  %s125_s1 = sshll.u32 %s225_s7, 4  ;;  %s127_s10 = sshll.u32 %s282_s5, 4  ;;  %s126_s1 = int_to_ptr.vmem [resolvable:$true] %s125_s1  ;;  %s128_s10 = int_to_ptr.hbm [resolvable:$true] %s127_s10 }
   0xf   :  { %75 = vmatmul.f32.vlgmr.msra.gmra.mxu0 %v57_v3 }
  0x10   :  { %139 = vmatmul.msk.f32.vlgmr.msra.gmra.mxu1 %vm87_vm1, %v85_v4 }
  0x13   :  { %v56_v5 = vld [vmem:[#allocation2] sm:$0x1] }
  0x8c   :  { %v76_v6 = vpop.f32.mrf.mxu0 }
  0x8d   :  { %v79_v7 = vadd.f32 %v76_v6, %v56_v5  ;;  %v111_v8 = vpop.f32.mrf.mxu1 }
  0x8f   :  { %81 = vst.msk [vmem:[#allocation2] sm:$0x1] %vm54_vm0, %v79_v7 }
  0x96   :  { %v114_v9 = vld [vmem:[#allocation2] sm:$0x1] }
  0x97   :  { %v115_v11 = vadd.f32 %v114_v9, %v111_v8 }
  0x99   :  { %v118_v12 = vadd.f32 %v117_v10, %v115_v11 }
  0x9b   :  { %119 = vst.msk [vmem:[#allocation9] sm:$0x1] %vm54_vm0, %v118_v12 }
  0x9c   :  { %130 = dma.vmem_to_hbm [thread:$0]  %s126_s1, 16, %s128_s10, [#allocation6]  }
  0x9d   :  { %220 = dma.done.wait [#allocation6], 16  }
  0x9e   :  { %221 = vsyncadd [#allocation6], 4294967280 }
  0x9f   :  { %135 = vsyncpa [#allocation5], 1 }
  0xa0   :  { %136 = vsyncpa [#allocation8], 1 }
  0xa1   :  { %137 = vsyncpa [#allocation6], 1 }

</bundles_post_ra>
